<compile_context>
chip_gen: v5e
topology: v5e:2x2
jax: 0.10.0
libtpu: 0.0.40
codegen_flags: <defaults>
</compile_context>

<pallas_src>
import functools
import math

import jax
import jax.numpy as jnp
from jax.experimental import pallas as pl
from jax.experimental.pallas import tpu as pltpu


def _round_up(x, m):
    return ((x + m - 1) // m) * m


def _scaled_softmax_kernel(scalar_ref, x_ref, o_ref, *, feat, pack):
    """One row-tile; each 128-lane row holds `pack` independent softmax
    segments of length `feat` (pack == 1 when feat >= 128 or not packable)."""
    scale = scalar_ref[0]                      # SMEM scalar (f32)
    x = x_ref[...].astype(jnp.float32) * scale
    for p in range(pack):                      # static unroll, pack is small
        lo = p * feat
        seg = x[:, lo:lo + feat]
        m = jnp.max(seg, axis=-1, keepdims=True)     # XLU reduce (stability)
        e = jnp.exp(seg - m)                         # EUP transcendental
        s = jnp.sum(e, axis=-1, keepdims=True)       # XLU reduce
        # EUP approx reciprocal + one Newton-Raphson step -> ~fp32 accuracy,
        # keeps the normalization off the VALU divide path.
        r = pl.reciprocal(s, approx=True)
        r = r * (2.0 - s * r)
        o_ref[:, lo:lo + feat] = (e * r).astype(o_ref.dtype)


def scaled_softmax(x, scalar, *, dim=-1,
                   block_bytes=2 * 1024 * 1024,
                   vmem_limit_bytes=48 * 1024 * 1024):
    """Softmax(scalar * x) along `dim` (Pallas TPU kernel on the last axis)."""
    ndim = x.ndim
    if dim is None:
        # PyTorch legacy F.softmax(dim=None) rule.
        dim = 0 if ndim in (0, 1, 3) else 1
    dim = dim % ndim
    if dim != ndim - 1:
        x = jnp.moveaxis(x, dim, -1)           # cheap XLA glue around the kernel

    orig_shape = x.shape
    feat = orig_shape[-1]
    rows = math.prod(orig_shape[:-1])
    x2 = x.reshape(rows, feat)

    dsize = jnp.dtype(x.dtype).itemsize
    sublane = 8 * max(1, 4 // dsize)           # 8 (f32), 16 (bf16), 32 (8-bit)

    # Lane packing: put several narrow softmax rows side-by-side in one
    # 128-lane row so HBM blocks / stores are lane-dense.
    pack = 128 // feat if (feat < 128 and 128 % feat == 0) else 1
    lane_w = pack * feat

    # Row tile: biggest sublane-aligned tile within the per-block byte budget
    # (mem-bound kernel -> large tiles amortize the ~0.35us/grid-step cost,
    # budget kept small enough for v7x's 64 MiB VMEM with double buffering).
    packed_rows = _round_up(rows, pack) // pack
    tm = block_bytes // max(1, lane_w * dsize)
    tm = max(sublane, (tm // sublane) * sublane)
    tm = min(tm, 1024)
    tm = min(tm, _round_up(packed_rows, sublane))

    total_packed_rows = _round_up(packed_rows, tm)
    rows_padded = total_packed_rows * pack
    if rows_padded != rows:
        x2 = jnp.pad(x2, ((0, rows_padded - rows), (0, 0)))   # zero rows -> discarded
    x_packed = x2.reshape(total_packed_rows, lane_w)

    grid = (total_packed_rows // tm,)
    scalar_arr = jnp.asarray(scalar, dtype=jnp.float32).reshape(1)

    kernel = functools.partial(_scaled_softmax_kernel, feat=feat, pack=pack)
    n = rows * feat
    out_packed = pl.pallas_call(
        kernel,
        out_shape=jax.ShapeDtypeStruct((total_packed_rows, lane_w), x.dtype),
        grid_spec=pltpu.PrefetchScalarGridSpec(
            num_scalar_prefetch=1,            # `scalar` lands in SMEM
            grid=grid,
            in_specs=[pl.BlockSpec((tm, lane_w), lambda i, s: (i, 0))],
            out_specs=pl.BlockSpec((tm, lane_w), lambda i, s: (i, 0)),
        ),
        compiler_params=pltpu.CompilerParams(
            dimension_semantics=("parallel",),
            vmem_limit_bytes=vmem_limit_bytes,
        ),
        cost_estimate=pl.CostEstimate(
            flops=5 * n,
            transcendentals=n,
            bytes_accessed=2 * n * dsize,
        ),
    )(scalar_arr, x_packed)

    out = out_packed.reshape(rows_padded, feat)[:rows].reshape(orig_shape)
    if dim != ndim - 1:
        out = jnp.moveaxis(out, -1, dim)
    return out


if __name__ == "__main__":
    key = jax.random.PRNGKey(0)
    k1, k2, k3 = jax.random.split(key, 3)
    scalar = 2.0   # module init: ScaledSoftmax(scalar=2.0, dim=-1)

    # Case 1: narrow feature axis -> lane-packed path (pack=4), B=2 S=8 H=32.
    x1 = jax.random.normal(k1, (2, 8, 32), dtype=jnp.float32)
    o1 = jax.block_until_ready(scaled_softmax(x1, scalar, dim=-1))
    r1 = jax.nn.softmax(scalar * x1, axis=-1)
    assert jnp.allclose(o1, r1, atol=1e-5, rtol=1e-5), "case1 mismatch"
    assert jnp.allclose(jnp.sum(o1, axis=-1), 1.0, atol=1e-5), "case1 rows != 1"

    # Case 2: feat >= 128 (pack=1); tiny block budget forces a multi-step grid
    # and a padded row tail (rows=60 -> 64) to exercise those paths.
    x2 = jax.random.normal(k2, (4, 15, 256), dtype=jnp.float32)
    o2 = jax.block_until_ready(
        scaled_softmax(x2, scalar, dim=-1, block_bytes=8 * 256 * 4))
    r2 = jax.nn.softmax(scalar * x2, axis=-1)
    assert jnp.allclose(o2, r2, atol=1e-5, rtol=1e-5), "case2 mismatch"

    # Case 3: non-last softmax axis (handled by moveaxis glue around the kernel).
    x3 = jax.random.normal(k3, (2, 32, 8), dtype=jnp.float32)
    o3 = jax.block_until_ready(scaled_softmax(x3, scalar, dim=1))
    r3 = jax.nn.softmax(scalar * x3, axis=1)
    assert jnp.allclose(o3, r3, atol=1e-5, rtol=1e-5), "case3 mismatch"

    print("KERNEL_OK")
</pallas_src>

<mosaic_0001>
module attributes {stable_mosaic.version = 11 : i64} {
  func.func @_scaled_softmax_kernel(%arg0: i32, %arg1: memref<1xf32, #tpu.memory_space<smem>>, %arg2: memref<8x128xf32, #tpu.memory_space<vmem>>, %arg3: memref<8x128xf32, #tpu.memory_space<vmem>>) attributes {dimension_semantics = [#tpu.dimension_semantics<parallel>], iteration_bounds = array<i64: 1>, scalar_prefetch = 1 : i64, scratch_operands = 0 : i64, tpu.core_type = #tpu.core_type<tc>, window_params = [{transform_indices = @transform_0, window_bounds = array<i64: 8, 128>}, {transform_indices = @transform_1, window_bounds = array<i64: 8, 128>}]} {
    %c0 = arith.constant 0 : index
    %0 = memref.load %arg1[%c0] : memref<1xf32, #tpu.memory_space<smem>>
    %c0_0 = arith.constant 0 : index
    %c0_1 = arith.constant 0 : index
    %1 = vector.load %arg2[%c0_0, %c0_1] : memref<8x128xf32, #tpu.memory_space<vmem>>, vector<8x128xf32>
    %2 = vector.broadcast %0 : f32 to vector<8x128xf32>
    %3 = arith.mulf %1, %2 : vector<8x128xf32>
    %4 = vector.extract_strided_slice %3 {offsets = [0, 0], sizes = [8, 32], strides = [1, 1]} : vector<8x128xf32> to vector<8x32xf32>
    %cst = arith.constant dense<0xFF800000> : vector<8xf32>
    %5 = vector.multi_reduction <maximumf>, %4, %cst [1] : vector<8x32xf32> to vector<8xf32>
    %6 = vector.shape_cast %5 : vector<8xf32> to vector<8x1xf32>
    %7 = vector.broadcast %6 : vector<8x1xf32> to vector<8x32xf32>
    %8 = arith.subf %4, %7 : vector<8x32xf32>
    %9 = math.exp %8 : vector<8x32xf32>
    %cst_2 = arith.constant dense<0.000000e+00> : vector<8xf32>
    %10 = vector.multi_reduction <add>, %9, %cst_2 [1] : vector<8x32xf32> to vector<8xf32>
    %11 = vector.shape_cast %10 : vector<8xf32> to vector<8x1xf32>
    %12 = tpu.reciprocal %11 {approx = true} : vector<8x1xf32> -> vector<8x1xf32>
    %13 = arith.mulf %11, %12 : vector<8x1xf32>
    %cst_3 = arith.constant 2.000000e+00 : f32
    %14 = vector.broadcast %cst_3 : f32 to vector<8x1xf32>
    %15 = arith.subf %14, %13 : vector<8x1xf32>
    %16 = arith.mulf %12, %15 : vector<8x1xf32>
    %17 = vector.broadcast %16 : vector<8x1xf32> to vector<8x32xf32>
    %18 = arith.mulf %9, %17 : vector<8x32xf32>
    %c0_4 = arith.constant 0 : index
    %c0_5 = arith.constant 0 : index
    %19 = vector.load %arg3[%c0_4, %c0_5] : memref<8x128xf32, #tpu.memory_space<vmem>>, vector<8x32xf32>
    tpu.vector_store %arg3[%c0_4, %c0_5], %18 {strides = array<i32>} : memref<8x128xf32, #tpu.memory_space<vmem>>, vector<8x32xf32>,
    %20 = vector.extract_strided_slice %3 {offsets = [0, 32], sizes = [8, 32], strides = [1, 1]} : vector<8x128xf32> to vector<8x32xf32>
    %cst_6 = arith.constant dense<0xFF800000> : vector<8xf32>
    %21 = vector.multi_reduction <maximumf>, %20, %cst_6 [1] : vector<8x32xf32> to vector<8xf32>
    %22 = vector.shape_cast %21 : vector<8xf32> to vector<8x1xf32>
    %23 = vector.broadcast %22 : vector<8x1xf32> to vector<8x32xf32>
    %24 = arith.subf %20, %23 : vector<8x32xf32>
    %25 = math.exp %24 : vector<8x32xf32>
    %cst_7 = arith.constant dense<0.000000e+00> : vector<8xf32>
    %26 = vector.multi_reduction <add>, %25, %cst_7 [1] : vector<8x32xf32> to vector<8xf32>
    %27 = vector.shape_cast %26 : vector<8xf32> to vector<8x1xf32>
    %28 = tpu.reciprocal %27 {approx = true} : vector<8x1xf32> -> vector<8x1xf32>
    %29 = arith.mulf %27, %28 : vector<8x1xf32>
    %cst_8 = arith.constant 2.000000e+00 : f32
    %30 = vector.broadcast %cst_8 : f32 to vector<8x1xf32>
    %31 = arith.subf %30, %29 : vector<8x1xf32>
    %32 = arith.mulf %28, %31 : vector<8x1xf32>
    %33 = vector.broadcast %32 : vector<8x1xf32> to vector<8x32xf32>
    %34 = arith.mulf %25, %33 : vector<8x32xf32>
    %c0_9 = arith.constant 0 : index
    %c32 = arith.constant 32 : index
    %35 = vector.load %arg3[%c0_9, %c32] : memref<8x128xf32, #tpu.memory_space<vmem>>, vector<8x32xf32>
    tpu.vector_store %arg3[%c0_9, %c32], %34 {strides = array<i32>} : memref<8x128xf32, #tpu.memory_space<vmem>>, vector<8x32xf32>,
    %36 = vector.extract_strided_slice %3 {offsets = [0, 64], sizes = [8, 32], strides = [1, 1]} : vector<8x128xf32> to vector<8x32xf32>
    %cst_10 = arith.constant dense<0xFF800000> : vector<8xf32>
    %37 = vector.multi_reduction <maximumf>, %36, %cst_10 [1] : vector<8x32xf32> to vector<8xf32>
    %38 = vector.shape_cast %37 : vector<8xf32> to vector<8x1xf32>
    %39 = vector.broadcast %38 : vector<8x1xf32> to vector<8x32xf32>
    %40 = arith.subf %36, %39 : vector<8x32xf32>
    %41 = math.exp %40 : vector<8x32xf32>
    %cst_11 = arith.constant dense<0.000000e+00> : vector<8xf32>
    %42 = vector.multi_reduction <add>, %41, %cst_11 [1] : vector<8x32xf32> to vector<8xf32>
    %43 = vector.shape_cast %42 : vector<8xf32> to vector<8x1xf32>
    %44 = tpu.reciprocal %43 {approx = true} : vector<8x1xf32> -> vector<8x1xf32>
    %45 = arith.mulf %43, %44 : vector<8x1xf32>
    %cst_12 = arith.constant 2.000000e+00 : f32
    %46 = vector.broadcast %cst_12 : f32 to vector<8x1xf32>
    %47 = arith.subf %46, %45 : vector<8x1xf32>
    %48 = arith.mulf %44, %47 : vector<8x1xf32>
    %49 = vector.broadcast %48 : vector<8x1xf32> to vector<8x32xf32>
    %50 = arith.mulf %41, %49 : vector<8x32xf32>
    %c0_13 = arith.constant 0 : index
    %c64 = arith.constant 64 : index
    %51 = vector.load %arg3[%c0_13, %c64] : memref<8x128xf32, #tpu.memory_space<vmem>>, vector<8x32xf32>
    tpu.vector_store %arg3[%c0_13, %c64], %50 {strides = array<i32>} : memref<8x128xf32, #tpu.memory_space<vmem>>, vector<8x32xf32>,
    %52 = vector.extract_strided_slice %3 {offsets = [0, 96], sizes = [8, 32], strides = [1, 1]} : vector<8x128xf32> to vector<8x32xf32>
    %cst_14 = arith.constant dense<0xFF800000> : vector<8xf32>
    %53 = vector.multi_reduction <maximumf>, %52, %cst_14 [1] : vector<8x32xf32> to vector<8xf32>
    %54 = vector.shape_cast %53 : vector<8xf32> to vector<8x1xf32>
    %55 = vector.broadcast %54 : vector<8x1xf32> to vector<8x32xf32>
    %56 = arith.subf %52, %55 : vector<8x32xf32>
    %57 = math.exp %56 : vector<8x32xf32>
    %cst_15 = arith.constant dense<0.000000e+00> : vector<8xf32>
    %58 = vector.multi_reduction <add>, %57, %cst_15 [1] : vector<8x32xf32> to vector<8xf32>
    %59 = vector.shape_cast %58 : vector<8xf32> to vector<8x1xf32>
    %60 = tpu.reciprocal %59 {approx = true} : vector<8x1xf32> -> vector<8x1xf32>
    %61 = arith.mulf %59, %60 : vector<8x1xf32>
    %cst_16 = arith.constant 2.000000e+00 : f32
    %62 = vector.broadcast %cst_16 : f32 to vector<8x1xf32>
    %63 = arith.subf %62, %61 : vector<8x1xf32>
    %64 = arith.mulf %60, %63 : vector<8x1xf32>
    %65 = vector.broadcast %64 : vector<8x1xf32> to vector<8x32xf32>
    %66 = arith.mulf %57, %65 : vector<8x32xf32>
    %c0_17 = arith.constant 0 : index
    %c96 = arith.constant 96 : index
    %67 = vector.load %arg3[%c0_17, %c96] : memref<8x128xf32, #tpu.memory_space<vmem>>, vector<8x32xf32>
    tpu.vector_store %arg3[%c0_17, %c96], %66 {strides = array<i32>} : memref<8x128xf32, #tpu.memory_space<vmem>>, vector<8x32xf32>,
    return
  }
  func.func @transform_0(%arg0: i32, %arg1: memref<1xf32, #tpu.memory_space<smem>>) -> (i32, i32) {
    %c0_i32 = arith.constant 0 : i32
    %c0_i32_0 = arith.constant 0 : i32
    return %arg0, %c0_i32 : i32, i32
  }
  func.func @transform_1(%arg0: i32, %arg1: memref<1xf32, #tpu.memory_space<smem>>) -> (i32, i32) {
    %c0_i32 = arith.constant 0 : i32
    %c0_i32_0 = arith.constant 0 : i32
    return %arg0, %c0_i32 : i32, i32
  }
}

</mosaic_0001>

<bundles_post_ra>
// kernel: tpu_custom_call.1
= control target key start
LH: loop header
LB: loop body
LE: loop exit
PB: predicated region body
PF: predicated region fallthrough
CT: control target
= control target key end

     0   :  { %8 = vsyncpa [#allocation5], 0  ;;  %s236_s0 = inlined_call_operand.<no memory space> [shape: f32[1], index: 0, kind: input, shape index: {}]   ;;  %s237_s1 = inlined_call_operand.hbm [shape: f32[8,128], index: 1, kind: input, shape index: {}]   ;;  %s238_s2 = inlined_call_operand.hbm [shape: f32[8,128], index: 2, kind: output, shape index: {}]  }
   0x1   :  { %9 = vsyncpa [#allocation6], 0  ;;  %s15_s11 = sshll.u32 %s237_s1, 4  ;;  %s195_s12 = smov [#allocation4]   ;;  %s16_s11 = int_to_ptr.hbm [resolvable:$true] %s15_s11 }
   0x2   :  { %s17_s13 = sshll.u32 %s195_s12, 4  ;;  %s18_s13 = int_to_ptr.vmem [resolvable:$true] %s17_s13 }
   0x3   :  { %20 = dma.hbm_to_vmem [thread:$0]  %s16_s11, 128, %s18_s13, [#allocation5]  }
   0x4   :  { %191 = dma.done.wait [#allocation5], 128  }
   0x5   :  { %192 = vsyncadd [#allocation5], 4294967168  ;;  %v27_v0 = vstv %s236_s0  ;;  %v26_v1 = vld [vmem:[#allocation4] sm:$0xff]  ;;  %vm85_vm0 = vcmask 1048320   ;;  %vm45_vm1 = vcmask 523520   ;;  %vm65_vm2 = vcmask 785920  }
   0x6   :  { %v28_v2 = vmul.f32 %v27_v0, %v26_v1  ;;  %vm29_vm3 = vcmask 261120   ;;  %s196_s0 = smov 32   ;;  %s197_s1 = smov 96  }
   0x7   :  { %s198_s16 = smov 64   ;;  %s199_s17 = smov [#allocation7]  }
   0x8   :  { %v86_v3 = vsel %vm85_vm0, %v28_v2, -inf  ;;  %v46_v4 = vsel %vm45_vm1, %v28_v2, -inf  ;;  %v66_v5 = vsel %vm65_vm2, %v28_v2, -inf  ;;  %v30_v6 = vsel %vm29_vm3, %v28_v2, -inf  ;;  %s110_s18 = sshll.u32 %s199_s17, 4  ;;  %s112_s21 = sshll.u32 %s238_s2, 4  ;;  %s111_s18 = int_to_ptr.vmem [resolvable:$true] %s110_s18  ;;  %s113_s21 = int_to_ptr.hbm [resolvable:$true] %s112_s21 }
   0x9   :  { %87 = vmax.xlane.f32.xlu1 %v86_v3  ;;  %47 = vmax.xlane.f32.xlu0 %v46_v4 }
  0x11   :  { %67 = vmax.xlane.f32.xlu0 %v66_v5  ;;  %31 = vmax.xlane.f32.xlu1 %v30_v6 }
  0x7c   :  { %v88_v7 = vpop.xlane.xlu1 %87  ;;  %v48_v8 = vpop.xlane.xlu0 %47 }
  0x7d   :  { %v89_v9 = vsub.f32 %v28_v2, %v88_v7  ;;  %v49_v10 = vsub.f32 %v28_v2, %v48_v8 }
  0x7f   :  { %v90_v11 = vmul.f32 1.442695, %v89_v9  ;;  %v50_v12 = vmul.f32 1.442695, %v49_v10 }
  0x81   :  { %127 = vpow2.f32 %v90_v11 }
  0x82   :  { %129 = vpow2.f32 %v50_v12 }
  0x84   :  { %v68_v13 = vpop.xlane.xlu0 %67  ;;  %v32_v14 = vpop.xlane.xlu1 %31 }
  0x85   :  { %v69_v15 = vsub.f32 %v28_v2, %v68_v13  ;;  %v33_v16 = vsub.f32 %v28_v2, %v32_v14 }
  0x87   :  { %v128_v17 = vpop.eup %127  ;;  %v70_v18 = vmul.f32 1.442695, %v69_v15  ;;  %v34_v19 = vmul.f32 1.442695, %v33_v16 }
  0x88   :  { %v130_v20 = vpop.eup %129  ;;  %93 = vrot.lane.b32.xlu0 %v128_v17, %s196_s0 }
  0x89   :  { %131 = vpow2.f32 %v70_v18  ;;  %53 = vrot.lane.b32.xlu2 %v130_v20, %s197_s1 }
  0x8a   :  { %133 = vpow2.f32 %v34_v19 }
  0x8f   :  { %v132_v21 = vpop.eup %131 }
  0x90   :  { %v134_v22 = vpop.eup %133 }
  0x91   :  { %73 = vrot.lane.b32.xlu2 %v132_v21, %s198_s16  ;;  %v36_v23 = vsel %vm29_vm3, %v134_v22, 0.0 }
  0x92   :  { %37 = vadd.xlane.f32.xlu1 %v36_v23 }
  0xe3   :  { %v54_v24 = vpop.permute.xlu2 %53 }
  0xe4   :  { %v56_v25 = vsel %vm29_vm3, %v54_v24, 0.0 }
  0xe5   :  { %57 = vadd.xlane.f32.xlu2 %v56_v25 }
  0xeb   :  { %v74_v26 = vpop.permute.xlu2 %73 }
  0xec   :  { %v76_v27 = vsel %vm29_vm3, %v74_v26, 0.0 }
  0xed   :  { %77 = vadd.xlane.f32.xlu1 %v76_v27 }
  0xfa   :  { %v94_v28 = vpop.permute.xlu0 %93 }
  0xfb   :  { %v96_v29 = vsel %vm29_vm3, %v94_v28, 0.0 }
  0xfc   :  { %97 = vadd.xlane.f32.xlu1 %v96_v29 }
 0x105   :  { %v38_v30 = vpop.xlane.xlu1 %37 }
 0x106   :  { %135 = vrcp.f32 %v38_v30 }
 0x10c   :  { %v136_v31 = vpop.eup %135 }
 0x10d   :  { %v40_v32 = vmul.f32 %v136_v31, %v38_v30 }
 0x10f   :  { %v41_v33 = vsub.f32 2.0, %v40_v32 }
 0x111   :  { %v42_v34 = vmul.f32 %v136_v31, %v41_v33 }
 0x113   :  { %v43_v35 = vmul.f32 %v134_v22, %v42_v34 }
 0x115   :  { %44 = vst.msk [vmem:[#allocation7] sm:$0xff] %vm29_vm3, %v43_v35 }
 0x158   :  { %v58_v36 = vpop.xlane.xlu2 %57 }
 0x159   :  { %137 = vrcp.f32 %v58_v36 }
 0x15f   :  { %v138_v37 = vpop.eup %137 }
 0x160   :  { %v60_v38 = vmul.f32 %v138_v37, %v58_v36  ;;  %v78_v39 = vpop.xlane.xlu1 %77 }
 0x161   :  { %139 = vrcp.f32 %v78_v39 }
 0x162   :  { %v61_v40 = vsub.f32 2.0, %v60_v38 }
 0x164   :  { %v62_v41 = vmul.f32 %v138_v37, %v61_v40 }
 0x166   :  { %v63_v42 = vmul.f32 %v130_v20, %v62_v41 }
 0x167   :  { %v140_v43 = vpop.eup %139 }
 0x168   :  { %64 = vst.msk [vmem:[#allocation7] sm:$0xff] %vm45_vm1, %v63_v42  ;;  %v80_v44 = vmul.f32 %v140_v43, %v78_v39 }
 0x16a   :  { %v81_v45 = vsub.f32 2.0, %v80_v44 }
 0x16c   :  { %v82_v46 = vmul.f32 %v140_v43, %v81_v45 }
 0x16e   :  { %v83_v47 = vmul.f32 %v132_v21, %v82_v46 }
 0x16f   :  { %v98_v48 = vpop.xlane.xlu1 %97 }
 0x170   :  { %84 = vst.msk [vmem:[#allocation7] sm:$0xff] %vm65_vm2, %v83_v47  ;;  %141 = vrcp.f32 %v98_v48 }
 0x176   :  { %v142_v49 = vpop.eup %141 }
 0x177   :  { %v100_v50 = vmul.f32 %v142_v49, %v98_v48 }
 0x179   :  { %v101_v51 = vsub.f32 2.0, %v100_v50 }
 0x17b   :  { %v102_v52 = vmul.f32 %v142_v49, %v101_v51 }
 0x17d   :  { %v103_v53 = vmul.f32 %v128_v17, %v102_v52 }
 0x17f   :  { %104 = vst.msk [vmem:[#allocation7] sm:$0xff] %vm85_vm0, %v103_v53 }
 0x180   :  { %115 = dma.vmem_to_hbm [thread:$0]  %s111_s18, 128, %s113_s21, [#allocation6]  }
 0x181   :  { %193 = dma.done.wait [#allocation6], 128  }
 0x182   :  { %194 = vsyncadd [#allocation6], 4294967168 }
 0x183   :  { %120 = vsyncpa [#allocation5], 1 }
 0x184   :  { %121 = vsyncpa [#allocation6], 1 }

</bundles_post_ra>
